<compile_context>
chip_gen: v7x
topology: tpu7x:2x2x1
jax: 0.10.0
libtpu: 0.0.40
codegen_flags: <defaults>
</compile_context>

<pallas_src>
import math

import jax
import jax.numpy as jnp
from jax.experimental import pallas as pl
from jax.experimental.pallas import tpu as pltpu

EPS = 1e-5  # nn.LayerNorm default eps

_MiB = 1024 * 1024
# Working-set budget per TensorCore. v7x has only 64 MiB physical VMEM per TC and each
# TC holds its own resident weight copy under "parallel" sharding, so stay well below
# that; v5e/v6e (128 MiB physical) get extra headroom for free.
_VMEM_BUDGET = 40 * _MiB
# If the folded weight alone exceeds this, stream it via class-dim (N) tiling instead
# of keeping it fully VMEM-resident.
_RESIDENT_WEIGHT_LIMIT = 16 * _MiB


def classifier_kernel(x_ref, w_ref, bias_ref, o_ref):
    """LayerNorm (affine pre-folded into the weight) + Linear on one tile.

    x_ref: (TR, D)   w_ref: (D, CT)   bias_ref: (1, CT)   o_ref: (TR, CT)
    """
    xf = x_ref[...].astype(jnp.float32)                      # LN stats in f32 (v5e-safe)
    mean = jnp.mean(xf, axis=-1, keepdims=True)              # (TR, 1)
    diff = xf - mean
    var = jnp.mean(diff * diff, axis=-1, keepdims=True)      # two-pass variance
    xn = diff * jax.lax.rsqrt(var + EPS)                     # (TR, D)
    xn = xn.astype(w_ref.dtype)                              # bf16 MXU path if weights are bf16
    out = jnp.dot(xn, w_ref[...], preferred_element_type=jnp.float32)   # (TR, CT) f32 acc
    out = out + bias_ref[...].astype(jnp.float32)
    o_ref[...] = out.astype(o_ref.dtype)


def prepare_classifier_params(gamma, beta, w_t, bias, weight_dtype=None):
    """Fold the LayerNorm affine into the Linear ONCE (hoisted out of the hot path).

        w_eff = gamma[:, None] * w_t        bias_eff = beta @ w_t + bias

    w_t is the PyTorch weight transposed: (dim, num_classes).
    Returns (w_fold (dim, C) in weight_dtype, bias_fold (1, C) f32).
    """
    wf = w_t.astype(jnp.float32)
    w_fold = gamma.astype(jnp.float32)[:, None] * wf
    bias_fold = beta.astype(jnp.float32) @ wf + bias.astype(jnp.float32)
    out_dt = weight_dtype if weight_dtype is not None else w_t.dtype
    return w_fold.astype(out_dt), bias_fold.reshape(1, -1)


def _pick_tile_rows(rows, dim, x_itemsize, out_cols, out_itemsize, fixed_bytes,
                    budget=_VMEM_BUDGET):
    """Pick a row tile so the whole pipelined working set fits the VMEM budget.

    Per-row bytes: x tile (2 buffers) + output tile (2 buffers) + ~2x f32 LN
    intermediates.  fixed_bytes = resident (or streamed, double-buffered) weight+bias.
    """
    per_row = 2 * dim * x_itemsize + 2 * out_cols * out_itemsize + 2 * dim * 4
    avail = budget - fixed_bytes - 1 * _MiB
    tr = max(8, avail // per_row)
    tr = min(tr, 2048)
    if rows <= tr:
        return rows                       # single full-extent block (always legal)
    if tr >= 128:
        tr = (tr // 128) * 128            # clean vreg / MXU-feed boundaries (covers bf16)
    else:
        tr = (tr // 8) * 8                # sublane alignment fallback
    return max(tr, 8)


def classifier_forward(x, w_fold, bias_fold, tile_rows=None, class_tile=None):
    """x: (..., dim).  w_fold: (dim, C) folded weight.  bias_fold: (1, C) f32.

    Returns (..., C) in x.dtype.
    """
    dim, num_classes = w_fold.shape
    lead = x.shape[:-1]
    rows = math.prod(lead) if lead else 1
    x2 = x.reshape(rows, dim)
    x_itemsize = x.dtype.itemsize

    w_bytes = dim * num_classes * w_fold.dtype.itemsize
    bias_bytes = bias_fold.size * bias_fold.dtype.itemsize
    use_class_tiling = (class_tile is not None) or (w_bytes > _RESIDENT_WEIGHT_LIMIT)

    if not use_class_tiling:
        # ---- Path A: weight fully VMEM-resident (single-buffered), 1-D row grid ----
        out_cols = num_classes            # un-padded output: full-extent last dim is legal
        out_pad = num_classes
        fixed_bytes = w_bytes + bias_bytes
        tr = tile_rows if tile_rows is not None else _pick_tile_rows(
            rows, dim, x_itemsize, out_cols, x_itemsize, fixed_bytes)
        tr = min(tr, rows)
        grid = (pl.cdiv(rows, tr),)
        in_specs = [
            pl.BlockSpec((tr, dim), lambda i: (i, 0)),                    # x: streamed rows
            pl.BlockSpec((dim, num_classes), lambda i: (0, 0),
                         pipeline_mode=pl.Buffered(1)),                   # weight: resident
            pl.BlockSpec((1, num_classes), lambda i: (0, 0),
                         pipeline_mode=pl.Buffered(1)),                   # bias: resident
        ]
        out_specs = pl.BlockSpec((tr, out_cols), lambda i: (i, 0))
        dim_sem = ("parallel",)
        w_call, b_call = w_fold, bias_fold
    else:
        # ---- Path B: class-dim (N) tiling; x stays resident across the class axis ----
        tn = class_tile if class_tile is not None else 512
        tn = max(128, (tn // 128) * 128)
        out_pad = ((num_classes + tn - 1) // tn) * tn
        pad = out_pad - num_classes
        # TODO(synk): for a huge classifier, hoist this padding to param-load time too.
        w_call = jnp.pad(w_fold, ((0, 0), (0, pad)))
        b_call = jnp.pad(bias_fold, ((0, 0), (0, pad)))
        out_cols = tn
        fixed_bytes = 2 * (dim * tn * w_call.dtype.itemsize + tn * 4)     # streamed, 2 bufs
        tr = tile_rows if tile_rows is not None else _pick_tile_rows(
            rows, dim, x_itemsize, out_cols, x_itemsize, fixed_bytes)
        tr = min(tr, rows)
        grid = (pl.cdiv(rows, tr), out_pad // tn)
        in_specs = [
            pl.BlockSpec((tr, dim), lambda i, j: (i, 0)),   # x block invariant across j
            pl.BlockSpec((dim, tn), lambda i, j: (0, j)),   # weight column block
            pl.BlockSpec((1, tn), lambda i, j: (0, j)),     # bias column block
        ]
        out_specs = pl.BlockSpec((tr, tn), lambda i, j: (i, j))
        dim_sem = ("parallel", "arbitrary")

    # Explicit VMEM budgeting (fixes v5e's 16 MiB default scoped limit; stays within
    # v7x's 64 MiB physical per-TC VMEM).
    per_row = 2 * dim * x_itemsize + 2 * out_cols * x_itemsize + 2 * dim * 4
    vmem_need = fixed_bytes + tr * per_row + 2 * _MiB
    vmem_limit = int(min(max(vmem_need, 32 * _MiB), 56 * _MiB))

    cost = pl.CostEstimate(
        flops=2 * rows * dim * out_pad,
        transcendentals=rows,  # one rsqrt per row
        bytes_accessed=int(rows * dim * x_itemsize
                           + rows * out_pad * x_itemsize
                           + dim * out_pad * w_call.dtype.itemsize
                           + out_pad * 4),
    )

    out = pl.pallas_call(
        classifier_kernel,
        out_shape=jax.ShapeDtypeStruct((rows, out_pad), x.dtype),
        grid_spec=pltpu.PrefetchScalarGridSpec(
            num_scalar_prefetch=0,
            grid=grid,
            in_specs=in_specs,
            out_specs=out_specs,
        ),
        compiler_params=pltpu.CompilerParams(
            dimension_semantics=dim_sem,          # row tiles -> dual-TC sharding on v7x
            vmem_limit_bytes=vmem_limit,
        ),
        cost_estimate=cost,
    )(x2, w_call, b_call)

    if out_pad != num_classes:
        out = out[:, :num_classes]
    return out.reshape(*lead, num_classes)


if __name__ == "__main__":
    def ref_forward(x, gamma, beta, w_t, bias):
        mean = jnp.mean(x, axis=-1, keepdims=True)
        var = jnp.mean((x - mean) ** 2, axis=-1, keepdims=True)
        xn = (x - mean) * jax.lax.rsqrt(var + EPS)
        return (xn * gamma + beta) @ w_t + bias

    # --- Test 1: resident-weight path (small Classifier shapes), f32, multi-tile rows ---
    batch, seq, dim, num_classes = 8, 100, 32, 16
    k = jax.random.split(jax.random.PRNGKey(0), 5)
    x = jax.random.normal(k[0], (batch, seq, dim), dtype=jnp.float32)
    gamma = 1.0 + 0.1 * jax.random.normal(k[1], (dim,), dtype=jnp.float32)
    beta = 0.1 * jax.random.normal(k[2], (dim,), dtype=jnp.float32)
    bound = 1.0 / math.sqrt(dim)
    w = jax.random.uniform(k[3], (num_classes, dim), minval=-bound, maxval=bound,
                           dtype=jnp.float32)
    b = jax.random.uniform(k[4], (num_classes,), minval=-bound, maxval=bound,
                           dtype=jnp.float32)

    w_fold, b_fold = prepare_classifier_params(gamma, beta, w.T, b)   # folded once
    out = jax.block_until_ready(classifier_forward(x, w_fold, b_fold, tile_rows=128))
    ref = ref_forward(x, gamma, beta, w.T, b)
    assert out.shape == (batch, seq, num_classes)
    assert jnp.allclose(out, ref, atol=1e-4, rtol=1e-4)

    # --- Test 2: class-tiled path with bf16 folded weights (large-C configuration) ---
    batch2, seq2, dim2, c2 = 4, 64, 128, 384
    k2 = jax.random.split(jax.random.PRNGKey(1), 5)
    x2 = jax.random.normal(k2[0], (batch2, seq2, dim2), dtype=jnp.float32)
    gamma2 = 1.0 + 0.1 * jax.random.normal(k2[1], (dim2,), dtype=jnp.float32)
    beta2 = 0.1 * jax.random.normal(k2[2], (dim2,), dtype=jnp.float32)
    bound2 = 1.0 / math.sqrt(dim2)
    w2 = jax.random.uniform(k2[3], (c2, dim2), minval=-bound2, maxval=bound2,
                            dtype=jnp.float32)
    b2 = jax.random.uniform(k2[4], (c2,), minval=-bound2, maxval=bound2,
                            dtype=jnp.float32)

    w_fold2, b_fold2 = prepare_classifier_params(gamma2, beta2, w2.T, b2,
                                                 weight_dtype=jnp.bfloat16)
    out2 = jax.block_until_ready(
        classifier_forward(x2, w_fold2, b_fold2, tile_rows=128, class_tile=128))
    ref2 = ref_forward(x2, gamma2, beta2, w2.T, b2)
    assert out2.shape == (batch2, seq2, c2)
    assert jnp.allclose(out2, ref2, atol=5e-2, rtol=5e-2)

    print("KERNEL_OK")
</pallas_src>

<mosaic_0001>
module attributes {stable_mosaic.version = 11 : i64} {
  func.func @classifier_kernel(%arg0: i32, %arg1: memref<128x32xf32, #tpu.memory_space<vmem>>, %arg2: memref<32x16xf32, #tpu.memory_space<vmem>>, %arg3: memref<1x16xf32, #tpu.memory_space<vmem>>, %arg4: memref<128x16xf32, #tpu.memory_space<vmem>>) attributes {dimension_semantics = [#tpu.dimension_semantics<parallel>], iteration_bounds = array<i64: 7>, scalar_prefetch = 0 : i64, scratch_operands = 0 : i64, tpu.core_type = #tpu.core_type<tc>, window_params = [{transform_indices = @transform_0, window_bounds = array<i64: 128, 32>}, {pipeline_mode = #tpu.pipeline_mode<synchronous>, transform_indices = @transform_1, window_bounds = array<i64: 32, 16>}, {pipeline_mode = #tpu.pipeline_mode<synchronous>, transform_indices = @transform_2, window_bounds = array<i64: 1, 16>}, {transform_indices = @transform_3, window_bounds = array<i64: 128, 16>}]} {
    %c0 = arith.constant 0 : index
    %c0_0 = arith.constant 0 : index
    %0 = vector.load %arg1[%c0, %c0_0] : memref<128x32xf32, #tpu.memory_space<vmem>>, vector<128x32xf32>
    %cst = arith.constant dense<0.000000e+00> : vector<128xf32>
    %1 = vector.multi_reduction <add>, %0, %cst [1] : vector<128x32xf32> to vector<128xf32>
    %2 = vector.shape_cast %1 : vector<128xf32> to vector<128x1xf32>
    %cst_1 = arith.constant 3.200000e+01 : f32
    %3 = vector.broadcast %cst_1 : f32 to vector<128x1xf32>
    %4 = arith.divf %2, %3 : vector<128x1xf32>
    %5 = vector.broadcast %4 : vector<128x1xf32> to vector<128x32xf32>
    %6 = arith.subf %0, %5 : vector<128x32xf32>
    %7 = arith.mulf %6, %6 : vector<128x32xf32>
    %cst_2 = arith.constant dense<0.000000e+00> : vector<128xf32>
    %8 = vector.multi_reduction <add>, %7, %cst_2 [1] : vector<128x32xf32> to vector<128xf32>
    %9 = vector.shape_cast %8 : vector<128xf32> to vector<128x1xf32>
    %cst_3 = arith.constant 3.200000e+01 : f32
    %10 = vector.broadcast %cst_3 : f32 to vector<128x1xf32>
    %11 = arith.divf %9, %10 : vector<128x1xf32>
    %cst_4 = arith.constant 9.99999974E-6 : f32
    %12 = vector.broadcast %cst_4 : f32 to vector<128x1xf32>
    %13 = arith.addf %11, %12 : vector<128x1xf32>
    %14 = math.rsqrt %13 : vector<128x1xf32>
    %15 = vector.broadcast %14 : vector<128x1xf32> to vector<128x32xf32>
    %16 = arith.mulf %6, %15 : vector<128x32xf32>
    %c0_5 = arith.constant 0 : index
    %c0_6 = arith.constant 0 : index
    %17 = vector.load %arg2[%c0_5, %c0_6] : memref<32x16xf32, #tpu.memory_space<vmem>>, vector<32x16xf32>
    %cst_7 = arith.constant dense<0.000000e+00> : vector<128x16xf32>
    %18 = tpu.matmul %16, %17, %cst_7 {dimension_numbers = #tpu.dot_dimension_numbers<[1], [0], [0], [1], [0, 0, 1, 1], [], []>} : vector<128x32xf32>, vector<32x16xf32>, vector<128x16xf32> -> vector<128x16xf32>
    %c0_8 = arith.constant 0 : index
    %c0_9 = arith.constant 0 : index
    %19 = vector.load %arg3[%c0_8, %c0_9] : memref<1x16xf32, #tpu.memory_space<vmem>>, vector<1x16xf32>
    %20 = vector.broadcast %19 : vector<1x16xf32> to vector<128x16xf32>
    %21 = arith.addf %18, %20 : vector<128x16xf32>
    %c0_10 = arith.constant 0 : index
    %c0_11 = arith.constant 0 : index
    %22 = vector.load %arg4[%c0_10, %c0_11] : memref<128x16xf32, #tpu.memory_space<vmem>>, vector<128x16xf32>
    tpu.vector_store %arg4[%c0_10, %c0_11], %21 {strides = array<i32>} : memref<128x16xf32, #tpu.memory_space<vmem>>, vector<128x16xf32>,
    return
  }
  func.func @transform_0(%arg0: i32) -> (i32, i32) {
    %c0_i32 = arith.constant 0 : i32
    %c0_i32_0 = arith.constant 0 : i32
    return %arg0, %c0_i32 : i32, i32
  }
  func.func @transform_1(%arg0: i32) -> (i32, i32) {
    %c0_i32 = arith.constant 0 : i32
    %c0_i32_0 = arith.constant 0 : i32
    %c0_i32_1 = arith.constant 0 : i32
    return %c0_i32, %c0_i32_0 : i32, i32
  }
  func.func @transform_2(%arg0: i32) -> (i32, i32) {
    %c0_i32 = arith.constant 0 : i32
    %c0_i32_0 = arith.constant 0 : i32
    %c0_i32_1 = arith.constant 0 : i32
    return %c0_i32, %c0_i32_0 : i32, i32
  }
  func.func @transform_3(%arg0: i32) -> (i32, i32) {
    %c0_i32 = arith.constant 0 : i32
    %c0_i32_0 = arith.constant 0 : i32
    return %arg0, %c0_i32 : i32, i32
  }
}

</mosaic_0001>

<bundles_post_ra>
// kernel: tpu_custom_call.1
= control target key start
LH: loop header
LB: loop body
LE: loop exit
PB: predicated region body
PF: predicated region fallthrough
CT: control target
= control target key end

     0   :  { %s1250_s12 = smov 0   ;;  %s1252_s13 = smov 0   ;;  %s1623_s0 = inlined_call_operand.vmem [shape: f32[800,32], index: 0, kind: input, shape index: {}]   ;;  %s1624_s1 = inlined_call_operand.vmem [shape: f32[32,16], index: 1, kind: input, shape index: {}]   ;;  %s1625_s2 = inlined_call_operand.vmem [shape: f32[1,16], index: 2, kind: input, shape index: {}]   ;;  %s1626_s3 = inlined_call_operand.vmem [shape: f32[800,16], index: 3, kind: output, shape index: {}]  }
   0x1   :  { %s1254_s14 = smov 0  }
   0x2 LB: > { %s1263_s15 = sadd.s32 4294967295, %s1196_s14   ;;  %s1265_s16 = sadd.s32 1, %s1196_s14   ;;  %s1196_s14 = sphi %s1254_s14, %s1633_s14   ;;  %s1192_s13 = sphi %s1252_s13, %s1632_s13   ;;  %s1188_s12 = sphi %s1250_s12, %s1631_s12  }
   0x3   : > { %s85_s17 = ssub.s32 %s1196_s14, %s1265_s16  ;;  %s88_s18 = sadd.s32 1, %s1192_s13 }
   0x4   : > { %p86_p0 = scmp.eq.s32.totalorder %s85_s17, 0  ;;  %p98_p1 = scmp.ne.s32.totalorder %s1192_s13, %s1188_s12 }
   0x5   : > { %p99_p2 = scmp.eq.s32.totalorder %s1263_s15, 6  ;;  %p917_p3 = scmp.ge.s32.totalorder %s1196_s14, 1 }
   0x6   : > { %s1273_s19 = scalar_select %p86_p0, %s1192_s13, %s88_s18  }
   0x7   : > { %p1275_p4 = por %p99_p2, %p98_p1  ;;  %p146_p5 = scmp.lt.s32.totalorder %s1196_s14, 8 }
   0x9   : > { %p147_p6 = pnand %p917_p3, %p146_p5 }
   0xa   : > { %s1280_s21 = sshll.u32 (!%p147_p6), %s1263_s15, 4  ;;  %vm208_vm0 = vcmask (!%p147_p6), 261120   ;;  %s170_s8 = sand.u32 (!%p147_p6), 1, %s1188_s12   ;;  %vm622_vm1 = vcmask (!%p147_p6), 130048  }
   0xb   : > { %150 = sbr.rel (%p147_p6) target bundleno = 629 (0x275), region = 32  ;;  %p178_p7 = scmp.lt.s32.totalorder (!%p147_p6), %s1280_s21, 99 }
   0xc   : > { %s918_s9 = sshll.u32 (!%p147_p6), %s170_s8, 7 }
   0xd   : > { %s1489_s14 = scalar_lea.vmem (!%p147_p6), [#allocation2], %s918_s9  }
  0x12   : > { %s179_s22 = scalar_select %p178_p7, %s1280_s21, 99 }
  0x13   : > { %s647_s12 = ssub.s32 (%p1275_p4), 100, %s1280_s21  ;;  %s955_s17 = sshll.u32 (%p1275_p4), %s1263_s15, 7 }
  0x14   : > { %s920_s23 = sshll.u32 %s179_s22, 3  ;;  %p648_p8 = scmp.lt.s32.totalorder (%p1275_p4), %s647_s12, 16 }
  0x15   : > { %s1287_s26 = scalar_lea.vmem %s1623_s0, %s920_s23  ;;  %s1530_s23 = scalar_lea.vmem (%p1275_p4), %s1626_s3, %s955_s17  }
  0x16   : > { %v192_v0 = vld [vmem:[%s1287_s26] sm:$0xff]  ;;  %v193_v1 = vld [vmem:[%s1287_s26 + $0x8] sm:$0xff]  ;;  %v194_v8 = vld [vmem:[%s1287_s26 + $0x10] sm:$0xff] }
  0x17   : > { %v200_v2 = vld [vmem:[%s1287_s26 + $0x40] sm:$0xff]  ;;  %v209_v3 = vsel %vm208_vm0, %v192_v0, 0.0  ;;  %v212_v4 = vsel %vm208_vm0, %v193_v1, 0.0  ;;  %v201_v5 = vld [vmem:[%s1287_s26 + $0x48] sm:$0xff]  ;;  %v202_v9 = vld [vmem:[%s1287_s26 + $0x50] sm:$0xff]  ;;  %v215_v10 = vsel %vm208_vm0, %v194_v8, 0.0 }
  0x18   : > { %210 = vadd.xlane.f32.xlu0 %v209_v3  ;;  %213 = vadd.xlane.f32.xlu1 %v212_v4  ;;  %v233_v6 = vsel %vm208_vm0, %v200_v2, 0.0  ;;  %v236_v7 = vsel %vm208_vm0, %v201_v5, 0.0  ;;  %v239_v11 = vsel %vm208_vm0, %v202_v9, 0.0  ;;  %v1302_v12 = vld [vmem:[%s1287_s26 + $0x18] sm:$0xff]  ;;  %v1312_v16 = vld [vmem:[%s1287_s26 + $0x20] sm:$0xff]  ;;  %v1322_v20 = vld [vmem:[%s1287_s26 + $0x28] sm:$0xff] }
  0x19   : > { %v1305_v13 = vld [vmem:[%s1287_s26 + $0x58] sm:$0xff]  ;;  %v218_v14 = vsel %vm208_vm0, %v1302_v12, 0.0  ;;  %v1315_v17 = vld [vmem:[%s1287_s26 + $0x60] sm:$0xff]  ;;  %v221_v18 = vsel %vm208_vm0, %v1312_v16, 0.0  ;;  %v1325_v21 = vld [vmem:[%s1287_s26 + $0x68] sm:$0xff]  ;;  %v224_v22 = vsel %vm208_vm0, %v1322_v20, 0.0 }
  0x1a   : > { %v242_v15 = vsel %vm208_vm0, %v1305_v13, 0.0  ;;  %v245_v19 = vsel %vm208_vm0, %v1315_v17, 0.0  ;;  %v248_v23 = vsel %vm208_vm0, %v1325_v21, 0.0  ;;  %v1332_v24 = vld [vmem:[%s1287_s26 + $0x30] sm:$0xff]  ;;  %v1342_v28 = vld [vmem:[%s1287_s26 + $0x38] sm:$0xff] }
  0x1b   : > { %v1335_v25 = vld [vmem:[%s1287_s26 + $0x70] sm:$0xff]  ;;  %v227_v26 = vsel %vm208_vm0, %v1332_v24, 0.0  ;;  %v1345_v29 = vld [vmem:[%s1287_s26 + $0x78] sm:$0xff]  ;;  %v230_v30 = vsel %vm208_vm0, %v1342_v28, 0.0 }
  0x1c   : > { %234 = vadd.xlane.f32.xlu0 %v233_v6  ;;  %237 = vadd.xlane.f32.xlu1 %v236_v7  ;;  %v251_v27 = vsel %vm208_vm0, %v1335_v25, 0.0  ;;  %v254_v31 = vsel %vm208_vm0, %v1345_v29, 0.0 }
  0x20   : > { %216 = vadd.xlane.f32.xlu0 %v215_v10  ;;  %240 = vadd.xlane.f32.xlu1 %v239_v11 }
  0x24   : > { %219 = vadd.xlane.f32.xlu0 %v218_v14  ;;  %243 = vadd.xlane.f32.xlu1 %v242_v15 }
  0x28   : > { %222 = vadd.xlane.f32.xlu0 %v221_v18  ;;  %246 = vadd.xlane.f32.xlu1 %v245_v19 }
  0x2c   : > { %225 = vadd.xlane.f32.xlu0 %v224_v22  ;;  %249 = vadd.xlane.f32.xlu1 %v248_v23 }
  0x30   : > { %228 = vadd.xlane.f32.xlu0 %v227_v26  ;;  %252 = vadd.xlane.f32.xlu1 %v251_v27 }
  0x34   : > { %231 = vadd.xlane.f32.xlu0 %v230_v30  ;;  %255 = vadd.xlane.f32.xlu1 %v254_v31 }
  0xa5   : > { %v211_v32 = vpop.xlane.xlu0 %210  ;;  %v214_v33 = vpop.xlane.xlu1 %213 }
  0xa6   : > { %v258_v34 = vmul.f32 0.03125, %v211_v32  ;;  %v259_v35 = vmul.f32 0.03125, %v214_v33 }
  0xa8   : > { %v1351_v36 = vsub.f32 %v192_v0, %v258_v34  ;;  %v1353_v37 = vsub.f32 %v193_v1, %v259_v35 }
  0xa9   : > { %v235_v38 = vpop.xlane.xlu0 %234  ;;  %v238_v39 = vpop.xlane.xlu1 %237 }
  0xaa   : > { %v266_v40 = vmul.f32 0.03125, %v235_v38  ;;  %v267_v41 = vmul.f32 0.03125, %v238_v39  ;;  %v290_v42 = vmul.f32 %v1351_v36, %v1351_v36  ;;  %v291_v43 = vmul.f32 %v1353_v37, %v1353_v37 }
  0xac   : > { %v1359_v44 = vsub.f32 %v200_v2, %v266_v40  ;;  %v1361_v45 = vsub.f32 %v201_v5, %v267_v41  ;;  %v306_v46 = vsel %vm208_vm0, %v290_v42, 0.0  ;;  %v309_v49 = vsel %vm208_vm0, %v291_v43, 0.0 }
  0xad   : > { %307 = vadd.xlane.f32.xlu0 %v306_v46  ;;  %v217_v47 = vpop.xlane.xlu0 %216  ;;  %v241_v48 = vpop.xlane.xlu1 %240 }
  0xae   : > { %v260_v50 = vmul.f32 0.03125, %v217_v47  ;;  %v268_v51 = vmul.f32 0.03125, %v241_v48  ;;  %v298_v52 = vmul.f32 %v1359_v44, %v1359_v44  ;;  %v299_v53 = vmul.f32 %v1361_v45, %v1361_v45 }
  0xb0   : > { %v1369_v54 = vsub.f32 %v194_v8, %v260_v50  ;;  %v1371_v55 = vsub.f32 %v202_v9, %v268_v51  ;;  %v330_v56 = vsel %vm208_vm0, %v298_v52, 0.0  ;;  %v333_v59 = vsel %vm208_vm0, %v299_v53, 0.0 }
  0xb1   : > { %310 = vadd.xlane.f32.xlu0 %v309_v49  ;;  %331 = vadd.xlane.f32.xlu1 %v330_v56  ;;  %v220_v57 = vpop.xlane.xlu0 %219  ;;  %v244_v58 = vpop.xlane.xlu1 %243 }
  0xb2   : > { %v261_v60 = vmul.f32 0.03125, %v220_v57  ;;  %v269_v61 = vmul.f32 0.03125, %v244_v58  ;;  %v292_v62 = vmul.f32 %v1369_v54, %v1369_v54  ;;  %v300_v63 = vmul.f32 %v1371_v55, %v1371_v55  ;;  %v420_v57 = vld [vmem:[%s1624_s1 + $0x10] sm:$0xff]  ;;  %v421_v58 = vld [vmem:[%s1624_s1 + $0x18] sm:$0xff] }
  0xb4   : > { %v1380_v0 = vsub.f32 %v1302_v12, %v261_v60  ;;  %v1383_v1 = vsub.f32 %v1305_v13, %v269_v61  ;;  %v312_v2 = vsel %vm208_vm0, %v292_v62, 0.0  ;;  %v336_v5 = vsel %vm208_vm0, %v300_v63, 0.0 }
  0xb5   : > { %334 = vadd.xlane.f32.xlu1 %v333_v59  ;;  %313 = vadd.xlane.f32.xlu0 %v312_v2  ;;  %v223_v3 = vpop.xlane.xlu0 %222  ;;  %v247_v4 = vpop.xlane.xlu1 %246  ;;  %v1014_v59 = vpack.c.bf16 %v421_v58, %v420_v57 }
  0xb6   : > { %v262_v6 = vmul.f32 0.03125, %v223_v3  ;;  %v270_v7 = vmul.f32 0.03125, %v247_v4  ;;  %v293_v8 = vmul.f32 %v1380_v0, %v1380_v0  ;;  %v301_v9 = vmul.f32 %v1383_v1, %v1383_v1 }
  0xb8   : > { %v1392_v10 = vsub.f32 %v1312_v16, %v262_v6  ;;  %v1395_v11 = vsub.f32 %v1315_v17, %v270_v7  ;;  %v315_v12 = vsel %vm208_vm0, %v293_v8, 0.0  ;;  %v339_v15 = vsel %vm208_vm0, %v301_v9, 0.0 }
  0xb9   : > { %337 = vadd.xlane.f32.xlu1 %v336_v5  ;;  %316 = vadd.xlane.f32.xlu0 %v315_v12  ;;  %v226_v13 = vpop.xlane.xlu0 %225  ;;  %v250_v14 = vpop.xlane.xlu1 %249 }
  0xba   : > { %v263_v18 = vmul.f32 0.03125, %v226_v13  ;;  %v271_v19 = vmul.f32 0.03125, %v250_v14  ;;  %v294_v22 = vmul.f32 %v1392_v10, %v1392_v10  ;;  %v302_v16 = vmul.f32 %v1395_v11, %v1395_v11 }
  0xbc   : > { %v1404_v23 = vsub.f32 %v1322_v20, %v263_v18  ;;  %v1407_v17 = vsub.f32 %v1325_v21, %v271_v19  ;;  %v318_v26 = vsel %vm208_vm0, %v294_v22, 0.0  ;;  %v342_v31 = vsel %vm208_vm0, %v302_v16, 0.0 }
  0xbd   : > { %340 = vadd.xlane.f32.xlu1 %v339_v15  ;;  %319 = vadd.xlane.f32.xlu0 %v318_v26  ;;  %v229_v27 = vpop.xlane.xlu0 %228  ;;  %v253_v30 = vpop.xlane.xlu1 %252 }
  0xbe   : > { %v264_v32 = vmul.f32 0.03125, %v229_v27  ;;  %v272_v33 = vmul.f32 0.03125, %v253_v30  ;;  %v295_v34 = vmul.f32 %v1404_v23, %v1404_v23  ;;  %v303_v20 = vmul.f32 %v1407_v17, %v1407_v17 }
  0xc0   : > { %v1416_v35 = vsub.f32 %v1332_v24, %v264_v32  ;;  %v1419_v21 = vsub.f32 %v1335_v25, %v272_v33  ;;  %v321_v38 = vsel %vm208_vm0, %v295_v34, 0.0  ;;  %v345_v41 = vsel %vm208_vm0, %v303_v20, 0.0 }
  0xc1   : > { %343 = vadd.xlane.f32.xlu1 %v342_v31  ;;  %322 = vadd.xlane.f32.xlu0 %v321_v38  ;;  %v232_v39 = vpop.xlane.xlu0 %231  ;;  %v256_v40 = vpop.xlane.xlu1 %255 }
  0xc2   : > { %v265_v42 = vmul.f32 0.03125, %v232_v39  ;;  %v273_v43 = vmul.f32 0.03125, %v256_v40  ;;  %v296_v46 = vmul.f32 %v1416_v35, %v1416_v35  ;;  %v304_v24 = vmul.f32 %v1419_v21, %v1419_v21 }
  0xc4   : > { %v1428_v47 = vsub.f32 %v1342_v28, %v265_v42  ;;  %v1431_v25 = vsub.f32 %v1345_v29, %v273_v43  ;;  %v324_v48 = vsel %vm208_vm0, %v296_v46, 0.0  ;;  %v348_v49 = vsel %vm208_vm0, %v304_v24, 0.0  ;;  %v418_v28 = vld [vmem:[%s1624_s1] sm:$0xff]  ;;  %v419_v29 = vld [vmem:[%s1624_s1 + $0x8] sm:$0xff] }
  0xc5   : > { %346 = vadd.xlane.f32.xlu1 %v345_v41  ;;  %325 = vadd.xlane.f32.xlu0 %v324_v48  ;;  %v1010_v52 = vpack.c.bf16 %v419_v29, %v418_v28 }
  0xc6   : > { %v297_v50 = vmul.f32 %v1428_v47, %v1428_v47  ;;  %v305_v51 = vmul.f32 %v1431_v25, %v1431_v25 }
  0xc7   : > { %1011 = vmatprep.subr.bf16.mxu0 %v1010_v52  ;;  %1018 = vmatprep.subr.bf16.mxu1 %v1010_v52 }
  0xc8   : > { %v327_v53 = vsel %vm208_vm0, %v297_v50, 0.0  ;;  %v351_v56 = vsel %vm208_vm0, %v305_v51, 0.0  ;;  %1013 = vmatpush3.bf16.msra.mxu0 %v1010_v52  ;;  %1020 = vmatpush3.bf16.msra.mxu1 %v1010_v52 }
  0xc9   : > { %349 = vadd.xlane.f32.xlu1 %v348_v49  ;;  %328 = vadd.xlane.f32.xlu0 %v327_v53 }
  0xca   : > { %1015 = vmatprep.subr.bf16.mxu0 %v1014_v59  ;;  %1019 = vmatprep.subr.bf16.mxu1 %v1014_v59 }
  0xcc   : > { %1017 = vmatpush3.bf16.msra.mxu0 %v1014_v59  ;;  %1021 = vmatpush3.bf16.msra.mxu1 %v1014_v59 }
  0xcd   : > { %352 = vadd.xlane.f32.xlu1 %v351_v56 }
 0x13a   : > { %v308_v60 = vpop.xlane.xlu0 %307 }
 0x13b   : > { %v354_v61 = vmul.f32 0.03125, %v308_v60 }
 0x13d   : > { %v370_v62 = vadd.f32 1e-05, %v354_v61 }
 0x13e   : > { %v332_v63 = vpop.xlane.xlu1 %331  ;;  %v311_v2 = vpop.xlane.xlu0 %310 }
 0x13f   : > { %1110 = vrsqrt.f32 %v370_v62  ;;  %v362_v3 = vmul.f32 0.03125, %v332_v63  ;;  %v355_v4 = vmul.f32 0.03125, %v311_v2 }
 0x141   : > { %v378_v5 = vadd.f32 1e-05, %v362_v3  ;;  %v371_v6 = vadd.f32 1e-05, %v355_v4 }
 0x142   : > { %v335_v7 = vpop.xlane.xlu1 %334  ;;  %v314_v8 = vpop.xlane.xlu0 %313 }
 0x143   : > { %1112 = vrsqrt.f32 %v378_v5  ;;  %v363_v9 = vmul.f32 0.03125, %v335_v7  ;;  %v356_v12 = vmul.f32 0.03125, %v314_v8 }
 0x144   : > { %1114 = vrsqrt.f32 %v371_v6 }
 0x145   : > { %v379_v13 = vadd.f32 1e-05, %v363_v9  ;;  %v372_v14 = vadd.f32 1e-05, %v356_v12 }
 0x146   : > { %v338_v15 = vpop.xlane.xlu1 %337  ;;  %v317_v18 = vpop.xlane.xlu0 %316 }
 0x147   : > { %1116 = vrsqrt.f32 %v379_v13  ;;  %v364_v19 = vmul.f32 0.03125, %v338_v15  ;;  %v357_v22 = vmul.f32 0.03125, %v317_v18 }
 0x148   : > { %1118 = vrsqrt.f32 %v372_v14 }
 0x149   : > { %v1111_v16 = vpop.eup %1110  ;;  %v380_v26 = vadd.f32 1e-05, %v364_v19  ;;  %v373_v27 = vadd.f32 1e-05, %v357_v22 }
 0x14a   : > { %v341_v30 = vpop.xlane.xlu1 %340  ;;  %v320_v31 = vpop.xlane.xlu0 %319  ;;  %v402_v32 = vmul.f32 %v1111_v16, %v1351_v36 }
 0x14b   : > { %1120 = vrsqrt.f32 %v380_v26  ;;  %v365_v33 = vmul.f32 0.03125, %v341_v30  ;;  %v358_v34 = vmul.f32 0.03125, %v320_v31 }
 0x14c   : > { %1122 = vrsqrt.f32 %v373_v27  ;;  %986 = vmatprep.mubr.msk.f32.mxu0 %vm208_vm0, %v402_v32 }
 0x14d   : > { %v1113_v20 = vpop.eup %1112  ;;  %v381_v38 = vadd.f32 1e-05, %v365_v33  ;;  %v374_v39 = vadd.f32 1e-05, %v358_v34 }
 0x14e   : > { %v1115_v40 = vpop.eup %1114  ;;  %v344_v41 = vpop.xlane.xlu1 %343  ;;  %v410_v43 = vmul.f32 %v1113_v20, %v1359_v44 }
 0x14f   : > { %v323_v42 = vpop.xlane.xlu0 %322  ;;  %1124 = vrsqrt.f32 %v381_v38  ;;  %v366_v46 = vmul.f32 0.03125, %v344_v41  ;;  %v403_v48 = vmul.f32 %v1115_v40, %v1353_v37 }
 0x150   : > { %v359_v24 = vmul.f32 0.03125, %v323_v42  ;;  %1126 = vrsqrt.f32 %v374_v39  ;;  %998 = vmatprep.mubr.msk.f32.mxu1 %vm208_vm0, %v410_v43 }
 0x151   : > { %v1117_v36 = vpop.eup %1116  ;;  %v382_v49 = vadd.f32 1e-05, %v366_v46  ;;  %987 = vmatmul.mubr.msk.f32.vlgmr.msra.gmra.mrb[0].mxu0 %vm208_vm0, %v403_v48 }
 0x152   : > { %v375_v50 = vadd.f32 1e-05, %v359_v24  ;;  %v1119_v51 = vpop.eup %1118  ;;  %v347_v28 = vpop.xlane.xlu1 %346  ;;  %v411_v52 = vmul.f32 %v1117_v36, %v1361_v45 }
 0x153   : > { %v326_v29 = vpop.xlane.xlu0 %325  ;;  %1128 = vrsqrt.f32 %v382_v49  ;;  %v367_v44 = vmul.f32 0.03125, %v347_v28  ;;  %v404_v56 = vmul.f32 %v1119_v51, %v1369_v54 }
 0x154   : > { %v360_v53 = vmul.f32 0.03125, %v326_v29  ;;  %1130 = vrsqrt.f32 %v375_v50  ;;  %999 = vmatmul.mubr.msk.f32.vlgmr.msra.gmra.mrb[0].mxu1 %vm208_vm0, %v411_v52 }
 0x155   : > { %v1121_v37 = vpop.eup %1120  ;;  %v383_v57 = vadd.f32 1e-05, %v367_v44  ;;  %989 = vmatprep.mubr.msk.f32.mxu0 %vm208_vm0, %v404_v56 }
 0x156   : > { %v376_v58 = vadd.f32 1e-05, %v360_v53  ;;  %v1123_v59 = vpop.eup %1122  ;;  %v350_v60 = vpop.xlane.xlu1 %349  ;;  %v412_v62 = vmul.f32 %v1121_v37, %v1371_v55 }
 0x157   : > { %v329_v61 = vpop.xlane.xlu0 %328  ;;  %1132 = vrsqrt.f32 %v383_v57  ;;  %v368_v45 = vmul.f32 0.03125, %v350_v60  ;;  %v405_v2 = vmul.f32 %v1123_v59, %v1380_v0 }
 0x158   : > { %v361_v63 = vmul.f32 0.03125, %v329_v61  ;;  %1134 = vrsqrt.f32 %v376_v58  ;;  %1001 = vmatprep.mubr.msk.f32.mxu1 %vm208_vm0, %v412_v62 }
 0x159   : > { %v1125_v54 = vpop.eup %1124  ;;  %v384_v3 = vadd.f32 1e-05, %v368_v45  ;;  %990 = vmatmul.mubr.msk.f32.gmra.mrb[2].mxu0 %vm208_vm0, %v405_v2 }
 0x15a   : > { %v377_v4 = vadd.f32 1e-05, %v361_v63  ;;  %v1127_v5 = vpop.eup %1126  ;;  %v353_v6 = vpop.xlane.xlu1 %352  ;;  %v413_v7 = vmul.f32 %v1125_v54, %v1383_v1 }
 0x15b   : > { %1136 = vrsqrt.f32 %v384_v3  ;;  %v369_v8 = vmul.f32 0.03125, %v353_v6  ;;  %v406_v55 = vmul.f32 %v1127_v5, %v1392_v10 }
 0x15c   : > { %1138 = vrsqrt.f32 %v377_v4  ;;  %1002 = vmatmul.mubr.msk.f32.gmra.mrb[2].mxu1 %vm208_vm0, %v413_v7 }
 0x15d   : > { %v1129_v0 = vpop.eup %1128  ;;  %v385_v9 = vadd.f32 1e-05, %v369_v8  ;;  %992 = vmatprep.mubr.msk.f32.mxu0 %vm208_vm0, %v406_v55 }
 0x15e   : > { %v1131_v12 = vpop.eup %1130  ;;  %v414_v13 = vmul.f32 %v1129_v0, %v1395_v11 }
 0x15f   : > { %1140 = vrsqrt.f32 %v385_v9  ;;  %v407_v14 = vmul.f32 %v1131_v12, %v1404_v23 }
 0x160   : > { %1004 = vmatprep.mubr.msk.f32.mxu1 %vm208_vm0, %v414_v13 }
 0x161   : > { %v1133_v1 = vpop.eup %1132  ;;  %993 = vmatmul.mubr.msk.f32.gmra.mrb[4].mxu0 %vm208_vm0, %v407_v14 }
 0x162   : > { %v1135_v10 = vpop.eup %1134  ;;  %v415_v15 = vmul.f32 %v1133_v1, %v1407_v17  ;;  %v921_v17 = vld [vmem:[%s1625_s2] ss:$0 sm:$0xff] }
 0x163   : > { %v408_v18 = vmul.f32 %v1135_v10, %v1416_v35 }
 0x164   : > { %1005 = vmatmul.mubr.msk.f32.gmra.mrb[4].mxu1 %vm208_vm0, %v415_v15 }
 0x165   : > { %v1137_v19 = vpop.eup %1136  ;;  %995 = vmatprep.mubr.msk.f32.mxu0 %vm208_vm0, %v408_v18 }
 0x166   : > { %v1139_v11 = vpop.eup %1138  ;;  %v416_v22 = vmul.f32 %v1137_v19, %v1419_v21 }
 0x167   : > { %v409_v23 = vmul.f32 %v1139_v11, %v1428_v47 }
 0x168   : > { %1007 = vmatprep.mubr.msk.f32.mxu1 %vm208_vm0, %v416_v22 }
 0x169   : > { %v1141_v16 = vpop.eup %1140  ;;  %996 = vmatmul.mubr.msk.f32.gmra.mrb[6].mxu0 %vm208_vm0, %v409_v23 }
 0x16a   : > { %v417_v26 = vmul.f32 %v1141_v16, %v1431_v25 }
 0x16c   : > { %1008 = vmatmul.mubr.msk.f32.gmra.mrb[6].mxu1 %vm208_vm0, %v417_v26 }
 0x224   : > { %v988_v35 = vpop.f32.mrb[0].mxu0 }
 0x225   : > { %v549_v21 = vadd.f32 %v988_v35, %v921_v17  ;;  %v543_v27 = vpop.f32.mrb[1].mxu0 }
 0x226   : > { %v544_v47 = vadd.f32 %v921_v17, %v543_v27 }
 0x227   : > { %624 = vst.msk [vmem:[%s1489_s14 + $0x8] sm:$0xff] %vm622_vm1, %v549_v21  ;;  %v1000_v25 = vpop.f32.mrb[0].mxu1 }
 0x228   : > { %623 = vst.msk [vmem:[%s1489_s14] sm:$0xff] %vm622_vm1, %v544_v47  ;;  %v589_v30 = vadd.f32 %v1000_v25, %v921_v17  ;;  %v583_v31 = vpop.f32.mrb[1].mxu1 }
 0x229   : > { %v584_v32 = vadd.f32 %v921_v17, %v583_v31 }
 0x22a   : > { %632 = vst.msk [vmem:[%s1489_s14 + $0x48] sm:$0xff] %vm622_vm1, %v589_v30 }
 0x22b   : > { %631 = vst.msk [vmem:[%s1489_s14 + $0x40] sm:$0xff] %vm622_vm1, %v584_v32 }
 0x22c   : > { %v991_v33 = vpop.f32.mrb[2].mxu0 }
 0x22d   : > { %v559_v34 = vadd.f32 %v991_v33, %v921_v17  ;;  %v553_v20 = vpop.f32.mrb[3].mxu0 }
 0x22e   : > { %v554_v38 = vadd.f32 %v921_v17, %v553_v20 }
 0x22f   : > { %626 = vst.msk [vmem:[%s1489_s14 + $0x18] sm:$0xff] %vm622_vm1, %v559_v34  ;;  %v1003_v39 = vpop.f32.mrb[2].mxu1 }
 0x230   : > { %625 = vst.msk [vmem:[%s1489_s14 + $0x10] sm:$0xff] %vm622_vm1, %v554_v38  ;;  %v599_v40 = vadd.f32 %v1003_v39, %v921_v17  ;;  %v593_v41 = vpop.f32.mrb[3].mxu1 }
 0x231   : > { %v594_v42 = vadd.f32 %v921_v17, %v593_v41 }
 0x232   : > { %634 = vst.msk [vmem:[%s1489_s14 + $0x58] sm:$0xff] %vm622_vm1, %v599_v40 }
 0x233   : > { %633 = vst.msk [vmem:[%s1489_s14 + $0x50] sm:$0xff] %vm622_vm1, %v594_v42 }
 0x234   : > { %v994_v43 = vpop.f32.mrb[4].mxu0 }
 0x235   : > { %v569_v46 = vadd.f32 %v994_v43, %v921_v17  ;;  %v563_v24 = vpop.f32.mrb[5].mxu0 }
 0x236   : > { %v564_v48 = vadd.f32 %v921_v17, %v563_v24 }
 0x237   : > { %628 = vst.msk [vmem:[%s1489_s14 + $0x28] sm:$0xff] %vm622_vm1, %v569_v46  ;;  %v1006_v36 = vpop.f32.mrb[4].mxu1 }
 0x238   : > { %627 = vst.msk [vmem:[%s1489_s14 + $0x20] sm:$0xff] %vm622_vm1, %v564_v48  ;;  %v609_v49 = vadd.f32 %v1006_v36, %v921_v17  ;;  %v603_v50 = vpop.f32.mrb[5].mxu1 }
 0x239   : > { %v604_v51 = vadd.f32 %v921_v17, %v603_v50 }
 0x23a   : > { %636 = vst.msk [vmem:[%s1489_s14 + $0x68] sm:$0xff] %vm622_vm1, %v609_v49 }
 0x23b   : > { %635 = vst.msk [vmem:[%s1489_s14 + $0x60] sm:$0xff] %vm622_vm1, %v604_v51 }
 0x23c   : > { %v997_v28 = vpop.f32.mrb[6].mxu0 }
 0x23d   : > { %v579_v29 = vadd.f32 %v997_v28, %v921_v17  ;;  %v573_v52 = vpop.f32.mrb[7].mxu0  ;;  %645 = sbr.rel (!%p1275_p4) target bundleno = 629 (0x275), region = 36 }
 0x23e   : > { %v574_v44 = vadd.f32 %v921_v17, %v573_v52 }
 0x23f   : > { %630 = vst.msk [vmem:[%s1489_s14 + $0x38] sm:$0xff] %vm622_vm1, %v579_v29  ;;  %v1009_v53 = vpop.f32.mrb[6].mxu1 }
 0x240   : > { %629 = vst.msk [vmem:[%s1489_s14 + $0x30] sm:$0xff] %vm622_vm1, %v574_v44  ;;  %v619_v56 = vadd.f32 %v1009_v53, %v921_v17  ;;  %v613_v37 = vpop.f32.mrb[7].mxu1 }
 0x241   : > { %v614_v57 = vadd.f32 %v921_v17, %v613_v37 }
 0x242   : > { %638 = vst.msk [vmem:[%s1489_s14 + $0x78] sm:$0xff] %vm622_vm1, %v619_v56 }
 0x243   : > { %637 = vst.msk [vmem:[%s1489_s14 + $0x70] sm:$0xff] %vm622_vm1, %v614_v57 }
 0x244   : > { %s1635_s12 = smov (!%p648_p8, %s647_s12), 16 }
 0x245   : > { %s940_s24 = sshll.u32 %s1635_s12, 7 }
 0x246   : > { %p943_p9 = scmp.eq.s32.totalorder %s940_s24, 0 }
 0x247   : > { %s1536_s25 = sshrl.u32 (!%p943_p9), %s1635_s12, 4 }
 0x248   : > { %656 = sbr.rel (%p943_p9) target bundleno = 629 (0x275), region = 40  ;;  %p944_p10 = scmp.le.s32.totalorder (!%p943_p9), %s1536_s25, 0 }
 0x24f   : > { %870 = sbr.rel (%p944_p10) target bundleno = 608 (0x260), region = 116  ;;  %s1628_s15 = smov (!%p944_p10), %s1530_s23 }
 0x250   : > { %s1629_s20 = smov (!%p944_p10), %s1489_s14  ;;  %s1545_s21 = smov (!%p944_p10), 0  }
 0x251   : > { %s1547_s26 = smov (!%p944_p10), 0  }
 0x256 LB: >> { %v748_v58 = vld [vmem:[%s1204_s20] sm:$0xff]  ;;  %v750_v59 = vld [vmem:[%s1204_s20 + $0x8] sm:$0xff]  ;;  %v752_v60 = vld [vmem:[%s1204_s20 + $0x10] sm:$0xff]  ;;  %s780_s27 = sadd.s32 1, %s1208_s21  ;;  %s742_s26 = sadd.s32 1, %s1212_s26   ;;  %s1212_s26 = sphi %s1547_s26, %s742_s26   ;;  %s1208_s21 = sphi %s1545_s21, %s1630_s21   ;;  %s1204_s20 = sphi %s1629_s20, %s785_s20   ;;  %s1200_s15 = sphi %s1628_s15, %s786_s15  }
 0x257   : >> { %749 = vst [vmem:[%s1200_s15] sm:$0xff] %v748_v58  ;;  %751 = vst [vmem:[%s1200_s15 + $0x8] sm:$0xff] %v750_v59  ;;  %v754_v61 = vld [vmem:[%s1204_s20 + $0x18] sm:$0xff]  ;;  %v756_v62 = vld [vmem:[%s1204_s20 + $0x20] sm:$0xff]  ;;  %p781_p11 = scmp.ge.s32.totalorder %s780_s27, %s1536_s25  ;;  %p741_p12 = scmp.ge.s32.totalorder %s742_s26, %s1536_s25 }
 0x258   : >> { %753 = vst [vmem:[%s1200_s15 + $0x10] sm:$0xff] %v752_v60  ;;  %v758_v45 = vld [vmem:[%s1204_s20 + $0x28] sm:$0xff]  ;;  %755 = vst [vmem:[%s1200_s15 + $0x18] sm:$0xff] %v754_v61  ;;  %v760_v63 = vld [vmem:[%s1204_s20 + $0x30] sm:$0xff] }
 0x259   : >> { %757 = vst [vmem:[%s1200_s15 + $0x20] sm:$0xff] %v756_v62  ;;  %759 = vst [vmem:[%s1200_s15 + $0x28] sm:$0xff] %v758_v45  ;;  %v762_v2 = vld [vmem:[%s1204_s20 + $0x38] sm:$0xff]  ;;  %v764_v54 = vld [vmem:[%s1204_s20 + $0x40] sm:$0xff]  ;;  %s1637_s27 = smov (%p781_p11, %s780_s27), 0  ;;  %744 = sbr.rel (!%p741_p12) target bundleno = 598 (0x256), region = 122 }
 0x25a   : >> { %761 = vst [vmem:[%s1200_s15 + $0x30] sm:$0xff] %v760_v63  ;;  %763 = vst [vmem:[%s1200_s15 + $0x38] sm:$0xff] %v762_v2  ;;  %v766_v3 = vld [vmem:[%s1204_s20 + $0x48] sm:$0xff]  ;;  %v768_v4 = vld [vmem:[%s1204_s20 + $0x50] sm:$0xff]  ;;  %s945_s28 = sshll.u32 %s1637_s27, 7  ;;  %s1630_s21 = smov %s1637_s27 }
 0x25b   : >> { %765 = vst [vmem:[%s1200_s15 + $0x40] sm:$0xff] %v764_v54  ;;  %v770_v5 = vld [vmem:[%s1204_s20 + $0x58] sm:$0xff]  ;;  %767 = vst [vmem:[%s1200_s15 + $0x48] sm:$0xff] %v766_v3  ;;  %v772_v6 = vld [vmem:[%s1204_s20 + $0x60] sm:$0xff] }
 0x25c   : >> { %769 = vst [vmem:[%s1200_s15 + $0x50] sm:$0xff] %v768_v4  ;;  %771 = vst [vmem:[%s1200_s15 + $0x58] sm:$0xff] %v770_v5  ;;  %v774_v7 = vld [vmem:[%s1204_s20 + $0x68] sm:$0xff]  ;;  %v776_v8 = vld [vmem:[%s1204_s20 + $0x70] sm:$0xff] }
 0x25d   : >> { %773 = vst [vmem:[%s1200_s15 + $0x60] sm:$0xff] %v772_v6  ;;  %775 = vst [vmem:[%s1200_s15 + $0x68] sm:$0xff] %v774_v7  ;;  %v778_v55 = vld [vmem:[%s1204_s20 + $0x78] sm:$0xff]  ;;  %s785_s20 = scalar_lea.vmem %s1489_s14, %s945_s28 [#allocation2]  }
 0x25e   : >> { %777 = vst [vmem:[%s1200_s15 + $0x70] sm:$0xff] %v776_v8  ;;  %779 = vst [vmem:[%s1200_s15 + $0x78] sm:$0xff] %v778_v55  ;;  %s786_s15 = scalar_lea.vmem %s1530_s23, %s945_s28  }
 0x260 PF: > { %s1605_s29 = sand.u32 15, %s1635_s12   ;;  %s956_s30 = sshll.u32 %s1536_s25, 7 }
 0x261   : > { %s791_s4 = scalar_lea.vmem %s1489_s14, %s956_s30 [#allocation2]   ;;  %s793_s5 = scalar_lea.vmem %s1530_s23, %s956_s30  }
 0x262   : > { %p950_p13 = scmp.le.s32.totalorder %s1605_s29, 0 }
 0x263   : > { %s1214_s6 = smov (!%p950_p13), %s793_s5   ;;  %s1218_s7 = smov (!%p950_p13), %s791_s4  }
 0x264   : > { %884 = sbr.rel (%p950_p13) target bundleno = 629 (0x275), region = 127  ;;  %s1222_s8 = smov (!%p950_p13), 0  }
 0x265   : > { %s1226_s9 = smov (!%p950_p13), 0  }
 0x26b LB: >> { %v803_v0 = vld [vmem:[%s1220_s7] sm:$0xff]  ;;  %s805_s10 = sadd.s32 1, %s1224_s8  ;;  %s797_s9 = sadd.s32 1, %s1228_s9   ;;  %s1228_s9 = sphi %s1226_s9, %s797_s9   ;;  %s1224_s8 = sphi %s1222_s8, %s1223_s8   ;;  %s1220_s7 = sphi %s1218_s7, %s810_s7   ;;  %s1216_s6 = sphi %s1214_s6, %s811_s6  }
 0x26c   : >> { %804 = vst [vmem:[%s1216_s6] sm:$0xff] %v803_v0  ;;  %p806_p0 = scmp.ge.s32.totalorder %s805_s10, %s1605_s29  ;;  %p796_p1 = scmp.ge.s32.totalorder %s797_s9, %s1605_s29 }
 0x26e   : >> { %s1639_s10 = smov (%p806_p0, %s805_s10), 0  ;;  %799 = sbr.rel (!%p796_p1) target bundleno = 619 (0x26b), region = 133 }
 0x26f   : >> { %s951_s11 = sshll.u32 %s1639_s10, 3  ;;  %s1223_s8 = smov %s1639_s10  }
 0x270   : >> { %s810_s7 = scalar_lea.vmem %s791_s4, %s951_s11 [#allocation2]   ;;  %s811_s6 = scalar_lea.vmem %s793_s5, %s951_s11  }
 0x275 PF: > { %p10_p2 = scmp.ge.s32.totalorder %s1265_s16, 9   ;;  %s1631_s12 = smov %s1192_s13 }
 0x276   : > { %s1632_s13 = smov %s1273_s19  ;;  %s1633_s14 = smov %s1265_s16 }
 0x277   :  { %12 = sbr.rel (!%p10_p2) target bundleno = 2 (0x2), region = 144 }

</bundles_post_ra>
